<compile_context>
chip_gen: v6e
topology: v6e:2x2x1
jax: 0.10.0
libtpu: 0.0.40
codegen_flags: <defaults>
</compile_context>

<pallas_src>
import jax
import jax.numpy as jnp
from jax.experimental import pallas as pl
from jax.experimental.pallas import tpu as pltpu

_LANE = 128
_VMEM_BUDGET = 48 * 1024 * 1024  # fits v7x's 64 MiB physical VMEM with headroom


def _adalora_kernel(u_ref, ev_ref, x_ref, o_ref, acc_ref):
    k = pl.program_id(1)

    @pl.when(k == 0)
    def _():
        acc_ref[...] = jnp.zeros_like(acc_ref)

    # t = EV[:, k_tile] @ x[k_tile, n_tile] -> (r, tn), f32 accumulation.
    t = jnp.dot(ev_ref[...], x_ref[...], preferred_element_type=jnp.float32)
    # Partial out tile: U @ t -> (in_dim, tn), accumulated in f32 scratch.
    acc_ref[...] += jnp.dot(u_ref[...], t, preferred_element_type=jnp.float32)

    @pl.when(k == pl.num_programs(1) - 1)
    def _():
        o_ref[...] = acc_ref[...].astype(o_ref.dtype)


def _divisor_tile(total, cap, quantum):
    """Largest t <= cap with t % quantum == 0 and total % t == 0; else total."""
    if total <= cap:
        return total
    t = (cap // quantum) * quantum
    while t >= quantum:
        if total % t == 0:
            return t
        t -= quantum
    # TODO(synk): totals not divisible by the lane quantum fall back to a
    # single block along that axis (correct, but loses tiling/parallelism).
    return total


def adalora_forward(u, e, v, x, scaling, *, tn=512, tk=2048):
    """out = (U @ (E*V)) * scaling @ x, computed as U @ (((E*V)*scaling) @ x)."""
    in_dim, r = u.shape
    out_dim = v.shape[1]
    n = x.shape[1]

    # Fold E (r,1) and scaling into V once in the wrapper; stream at x's dtype
    # so bf16 callers get a pure bf16 MXU path with half the DMA bytes.
    ev = (e * v * scaling).astype(x.dtype)

    # ---- tile selection -----------------------------------------------------
    # N tile: lane-dense and small enough that the single "parallel" axis has
    # >= 2 steps, so both v7x TensorCores get work.
    tn = min(tn, n)
    if n >= 2 * _LANE:
        tn = min(tn, max(_LANE, (n // 2) // _LANE * _LANE))
    tn = _divisor_tile(n, tn, _LANE)
    # Contraction (out_dim) tile: bounds the streamed (tk, tn) x block.
    tk = _divisor_tile(out_dim, min(tk, out_dim), _LANE)

    # ---- explicit VMEM budget (double-buffered pipelined blocks + scratch) --
    def vmem_bytes(tn_, tk_):
        return (2 * in_dim * r * u.dtype.itemsize        # U blocks
                + 2 * r * tk_ * ev.dtype.itemsize        # EV blocks
                + 2 * tk_ * tn_ * x.dtype.itemsize       # x blocks
                + 2 * in_dim * tn_ * x.dtype.itemsize    # output blocks
                + in_dim * tn_ * 4)                      # f32 accumulator

    while vmem_bytes(tn, tk) > _VMEM_BUDGET:
        if tn >= tk and tn > _LANE:
            new_tn = _divisor_tile(n, max(_LANE, tn // 2), _LANE)
            if new_tn >= tn:
                break
            tn = new_tn
        elif tk > _LANE:
            new_tk = _divisor_tile(out_dim, max(_LANE, tk // 2), _LANE)
            if new_tk >= tk:
                break
            tk = new_tk
        else:
            break

    vmem_limit = int(min(_VMEM_BUDGET,
                         max(vmem_bytes(tn, tk) * 5 // 4, 16 * 1024 * 1024)))

    grid = (pl.cdiv(n, tn), pl.cdiv(out_dim, tk))
    return pl.pallas_call(
        _adalora_kernel,
        out_shape=jax.ShapeDtypeStruct((in_dim, n), x.dtype),
        grid=grid,
        in_specs=[
            pl.BlockSpec((in_dim, r), lambda j, k: (0, 0)),   # U: tiny, resident
            pl.BlockSpec((r, tk), lambda j, k: (0, k)),       # EV: contraction-tiled
            pl.BlockSpec((tk, tn), lambda j, k: (k, j)),      # x: streamed tiles
        ],
        out_specs=pl.BlockSpec((in_dim, tn), lambda j, k: (0, j)),
        scratch_shapes=[pltpu.VMEM((in_dim, tn), jnp.float32)],
        compiler_params=pltpu.CompilerParams(
            dimension_semantics=("parallel", "arbitrary"),
            vmem_limit_bytes=vmem_limit),
    )(u, ev, x)


if __name__ == "__main__":
    # Small but lane-dense shapes (N and out_dim multiples of 128).
    in_dim, out_dim, r, n = 128, 256, 8, 512
    alpha = 4
    scaling = alpha if alpha > 0 else float(r)

    key = jax.random.PRNGKey(0)
    ku, ke, kv, kx = jax.random.split(key, 4)

    lora_U = 0.02 * jax.random.normal(ku, (in_dim, r), dtype=jnp.float32)
    lora_E = 0.02 * jax.random.normal(ke, (r, 1), dtype=jnp.float32)
    lora_V = 0.02 * jax.random.normal(kv, (r, out_dim), dtype=jnp.float32)
    x = jax.random.normal(kx, (out_dim, n), dtype=jnp.float32)

    out = adalora_forward(lora_U, lora_E, lora_V, x, scaling)
    out = jax.block_until_ready(out)
    assert out.shape == (in_dim, n)

    # Reference 1: same re-associated f32 math as the kernel.
    ev_ref = lora_E * lora_V * scaling
    ref_kernel_order = lora_U @ (ev_ref @ x)
    assert jnp.allclose(out, ref_kernel_order, atol=1e-4, rtol=1e-2), \
        "mismatch vs matching-order f32 reference"

    # Reference 2: original PyTorch-order f32 math (dense UEV first).
    ref_module = jnp.matmul(jnp.matmul(lora_U, lora_E * lora_V) * scaling, x)
    assert jnp.allclose(out, ref_module, atol=1e-4, rtol=1e-2), \
        "mismatch vs module-order f32 reference"

    # bf16-activation path: streaming x as bf16 halves the dominant DMA bytes.
    out_bf16 = adalora_forward(lora_U, lora_E, lora_V,
                               x.astype(jnp.bfloat16), scaling)
    out_bf16 = jax.block_until_ready(out_bf16)
    assert out_bf16.dtype == jnp.bfloat16
    assert jnp.allclose(out_bf16.astype(jnp.float32), ref_module,
                        atol=1e-4, rtol=5e-2), \
        "mismatch vs f32 reference (bf16 activations)"

    print("KERNEL_OK")
</pallas_src>

<mosaic_0001>
module attributes {stable_mosaic.version = 11 : i64} {
  func.func @_adalora_kernel(%arg0: i32, %arg1: i32, %arg2: memref<128x8xf32, #tpu.memory_space<vmem>>, %arg3: memref<8x256xf32, #tpu.memory_space<vmem>>, %arg4: memref<256x256xf32, #tpu.memory_space<vmem>>, %arg5: memref<128x256xf32, #tpu.memory_space<vmem>>, %arg6: memref<128x256xf32, #tpu.memory_space<vmem>>) attributes {dimension_semantics = [#tpu.dimension_semantics<parallel>, #tpu.dimension_semantics<arbitrary>], iteration_bounds = array<i64: 2, 1>, scalar_prefetch = 0 : i64, scratch_operands = 1 : i64, tpu.core_type = #tpu.core_type<tc>, window_params = [{pipeline_mode = #tpu.pipeline_mode<synchronous>, transform_indices = @transform_0, window_bounds = array<i64: 128, 8>}, {transform_indices = @transform_1, window_bounds = array<i64: 8, 256>}, {transform_indices = @transform_2, window_bounds = array<i64: 256, 256>}, {transform_indices = @transform_3, window_bounds = array<i64: 128, 256>}]} {
    %c0_i32 = arith.constant 0 : i32
    %0 = arith.cmpi eq, %arg1, %c0_i32 : i32
    %1 = arith.extui %0 : i1 to i32
    %c0_i32_0 = arith.constant 0 : i32
    %2 = arith.cmpi ne, %1, %c0_i32_0 : i32
    scf.if %2 {
      %cst_13 = arith.constant 0.000000e+00 : f32
      %14 = vector.broadcast %cst_13 : f32 to vector<128x256xf32>
      %c0_14 = arith.constant 0 : index
      %c0_15 = arith.constant 0 : index
      %15 = vector.load %arg6[%c0_14, %c0_15] : memref<128x256xf32, #tpu.memory_space<vmem>>, vector<128x256xf32>
      tpu.vector_store %arg6[%c0_14, %c0_15], %14 {strides = array<i32>} : memref<128x256xf32, #tpu.memory_space<vmem>>, vector<128x256xf32>,
    } else {
    }
    %c0 = arith.constant 0 : index
    %c0_1 = arith.constant 0 : index
    %3 = vector.load %arg3[%c0, %c0_1] : memref<8x256xf32, #tpu.memory_space<vmem>>, vector<8x256xf32>
    %c0_2 = arith.constant 0 : index
    %c0_3 = arith.constant 0 : index
    %4 = vector.load %arg4[%c0_2, %c0_3] : memref<256x256xf32, #tpu.memory_space<vmem>>, vector<256x256xf32>
    %cst = arith.constant dense<0.000000e+00> : vector<8x256xf32>
    %5 = tpu.matmul %3, %4, %cst {dimension_numbers = #tpu.dot_dimension_numbers<[1], [0], [0], [1], [0, 0, 1, 1], [], []>} : vector<8x256xf32>, vector<256x256xf32>, vector<8x256xf32> -> vector<8x256xf32>
    %c0_4 = arith.constant 0 : index
    %c0_5 = arith.constant 0 : index
    %6 = vector.load %arg6[%c0_4, %c0_5] : memref<128x256xf32, #tpu.memory_space<vmem>>, vector<128x256xf32>
    %c0_6 = arith.constant 0 : index
    %c0_7 = arith.constant 0 : index
    %7 = vector.load %arg2[%c0_6, %c0_7] : memref<128x8xf32, #tpu.memory_space<vmem>>, vector<128x8xf32>
    %cst_8 = arith.constant dense<0.000000e+00> : vector<128x256xf32>
    %8 = tpu.matmul %7, %5, %cst_8 {dimension_numbers = #tpu.dot_dimension_numbers<[1], [0], [0], [1], [0, 0, 1, 1], [], []>} : vector<128x8xf32>, vector<8x256xf32>, vector<128x256xf32> -> vector<128x256xf32>
    %9 = arith.addf %6, %8 : vector<128x256xf32>
    %c0_9 = arith.constant 0 : index
    %c0_10 = arith.constant 0 : index
    %10 = vector.load %arg6[%c0_9, %c0_10] : memref<128x256xf32, #tpu.memory_space<vmem>>, vector<128x256xf32>
    tpu.vector_store %arg6[%c0_9, %c0_10], %9 {strides = array<i32>} : memref<128x256xf32, #tpu.memory_space<vmem>>, vector<128x256xf32>,
    %c0_i32_11 = arith.constant 0 : i32
    %11 = arith.cmpi eq, %arg1, %c0_i32_11 : i32
    %12 = arith.extui %11 : i1 to i32
    %c0_i32_12 = arith.constant 0 : i32
    %13 = arith.cmpi ne, %12, %c0_i32_12 : i32
    scf.if %13 {
      %c0_13 = arith.constant 0 : index
      %c0_14 = arith.constant 0 : index
      %14 = vector.load %arg6[%c0_13, %c0_14] : memref<128x256xf32, #tpu.memory_space<vmem>>, vector<128x256xf32>
      %c0_15 = arith.constant 0 : index
      %c0_16 = arith.constant 0 : index
      %15 = vector.load %arg5[%c0_15, %c0_16] : memref<128x256xf32, #tpu.memory_space<vmem>>, vector<128x256xf32>
      tpu.vector_store %arg5[%c0_15, %c0_16], %14 {strides = array<i32>} : memref<128x256xf32, #tpu.memory_space<vmem>>, vector<128x256xf32>,
    } else {
    }
    return
  }
  func.func @transform_0(%arg0: i32, %arg1: i32) -> (i32, i32) {
    %c0_i32 = arith.constant 0 : i32
    %c0_i32_0 = arith.constant 0 : i32
    %c0_i32_1 = arith.constant 0 : i32
    return %c0_i32, %c0_i32_0 : i32, i32
  }
  func.func @transform_1(%arg0: i32, %arg1: i32) -> (i32, i32) {
    %c0_i32 = arith.constant 0 : i32
    %c0_i32_0 = arith.constant 0 : i32
    return %c0_i32, %arg1 : i32, i32
  }
  func.func @transform_2(%arg0: i32, %arg1: i32) -> (i32, i32) {
    %c0_i32 = arith.constant 0 : i32
    return %arg1, %arg0 : i32, i32
  }
  func.func @transform_3(%arg0: i32, %arg1: i32) -> (i32, i32) {
    %c0_i32 = arith.constant 0 : i32
    %c0_i32_0 = arith.constant 0 : i32
    return %c0_i32, %arg0 : i32, i32
  }
}

</mosaic_0001>

<bundles_post_ra>
// kernel: tpu_custom_call.1
= control target key start
LH: loop header
LB: loop body
LE: loop exit
PB: predicated region body
PF: predicated region fallthrough
CT: control target
= control target key end

     0   :  { %8 = vsyncpa [#allocation4], 0  ;;  %s1464_s0 = inlined_call_operand.vmem [shape: f32[128,8], index: 0, kind: input, shape index: {}]   ;;  %s1465_s1 = inlined_call_operand.vmem [shape: f32[8,256], index: 1, kind: input, shape index: {}]   ;;  %s1466_s2 = inlined_call_operand.hbm [shape: f32[256,512], index: 2, kind: input, shape index: {}]   ;;  %s1467_s3 = inlined_call_operand.hbm [shape: f32[128,512], index: 3, kind: output, shape index: {}]  }
   0x1   :  { %10 = vsyncpa [#allocation4 + $0x1], 0 }
   0x2   :  { %11 = vsyncpa [#allocation5], 0 }
   0x3   :  { %13 = vsyncpa [#allocation5 + $0x1], 0  ;;  %s1148_s12 = smov 0   ;;  %s1150_s13 = smov 0  }
   0x4   :  { %s1152_s14 = smov 0   ;;  %s1154_s15 = smov 0  }
   0x5   :  { %s1156_s16 = smov 0   ;;  %s1158_s17 = smov 0  }
   0x6 LB: > { %s906_s18 = sadd.s32 4294967295, %s1117_s17   ;;  %s907_s19 = sadd.s32 4294967294, %s1117_s17   ;;  %s1117_s17 = sphi %s1158_s17, %s19_s17   ;;  %s1113_s16 = sphi %s1156_s16, %s1478_s16   ;;  %s1109_s15 = sphi %s1154_s15, %s1477_s15   ;;  %s1105_s14 = sphi %s1152_s14, %s1476_s14   ;;  %s1101_s13 = sphi %s1150_s13, %s1475_s13   ;;  %s1097_s12 = sphi %s1148_s12, %s1474_s12  }
   0x7   : > { %s31_s20 = sadd.s32 1, %s1113_s16  ;;  %s87_s21 = sadd.s32 1, %s1105_s14 }
   0x8   : > { %p33_p0 = scmp.ge.s32.totalorder %s31_s20, 2  ;;  %p94_p1 = scmp.ne.s32.totalorder %s1105_s14, %s1101_s13 }
   0x9   : > { %p95_p2 = scmp.eq.s32.totalorder %s1117_s17, 0  ;;  %p100_p3 = scmp.ne.s32.totalorder %s1101_s13, %s1097_s12 }
   0xa   : > { %s1480_s20 = smov (%p33_p0, %s31_s20), 0  ;;  %p101_p5 = scmp.eq.s32.totalorder %s906_s18, 0 }
   0xb   : > { %p1189_p4 = por %p95_p2, %p94_p1  ;;  %s83_s23 = ssub.s32 %s1113_s16, %s1480_s20 }
   0xc   : > { %p124_p6 = scmp.eq.s32.totalorder %s906_s18, 1  ;;  %p85_p7 = scmp.eq.s32.totalorder %s83_s23, 0 }
   0xd   : > { %p1195_p8 = por %p101_p5, %p100_p3  ;;  %p130_p10 = scmp.eq.s32.totalorder %s907_s19, 1 }
   0xe   : > { %p1199_p9 = por %p124_p6, %p94_p1  ;;  %p952_p13 = scmp.lt.s32.totalorder %s1117_s17, 2 }
   0xf   : > { %s1204_s26 = scalar_select %p85_p7, %s1105_s14, %s87_s21  }
  0x10   : > { %p1206_p11 = por %p130_p10, %p100_p3  ;;  %s162_s28 = sand.u32 1, %s1105_s14  }
  0x11   : > { %s911_s29 = sshll.u32 %s162_s28, 9  ;;  %s938_s30 = sshll.u32 %s1113_s16, 8 }
  0x12   : > { %s175_s6 = scalar_lea.hbm %s1466_s2, %s938_s30  ;;  %s166_s7 = scalar_lea.vmem [#allocation3], %s911_s29 }
  0x13   : > { %s176_s8 = sshll.u32 %s166_s7, 4  ;;  %p1219_p0 = pnand %p952_p13, %p1189_p4  ;;  %s177_s8 = int_to_ptr.vmem [resolvable:$true] %s176_s8 }
  0x14   : > { %s163_s10 = scalar_lea.sflag [#allocation4], %s162_s28  ;;  %s1022_s11 = scalar_lea.vmem %s177_s8, 8192 }
  0x15   : > { %p1011_p1 = pneg %p1219_p0  ;;  %p1023_p2 = scmp.ne.s32.totalorder %s177_s8, %s1022_s11 }
  0x16   : > { %s1119_s18 = smov [#allocation3]  }
  0x17   : > { %p1025_p3 = pnand %p1023_p2, %p1011_p1  ;;  %s1027_s19 = sshll.u32 %s1119_s18, 4  ;;  %s1028_s19 = int_to_ptr.vmem [resolvable:$false] %s1027_s19 }
  0x18   : > { %s1029_s21 = scalar_lea.vmem %s1028_s19, 16384  ;;  %p1030_p6 = scmp.lt.s32.totalorder %s177_s8, %s1028_s19 }
  0x19   : > { %p1026_p5 = pneg %p1025_p3  ;;  %p1031_p7 = scmp.lt.s32.totalorder %s1029_s21, %s1022_s11 }
  0x1b   : > { %p1032_p10 = por %p1031_p7, %p1030_p6 }
  0x1d   : > { %p1033_p12 = pnand %p1032_p10, %p1026_p5 }
  0x1f   : > { %1036 = shalt.err (!%p1033_p12)
}
  0x20   : > { %s1120_s22 = smov 512   ;;  %s1121_s23 = smov 256  }
  0x21   : > { %s1122_s28 = smov 16   ;;  %p914_p4 = scmp.ge.s32.totalorder %s1117_s17, 1 }
  0x22   : > { %947 = dma.hbm_to_vmem [thread:$0]  (!%p1219_p0), %s175_s6, 8192, %s177_s8, %s163_s10, %s1120_s22, %s1121_s23, %s1122_s28  }
  0x23   : > { %p184_p13 = scmp.lt.s32.totalorder %s1117_s17, 3 }
  0x25   : > { %p185_p1 = pnand %p914_p4, %p184_p13 }
  0x26   : > { %s1230_s29 = sand.u32 (!%p185_p1), 1, %s1101_s13  }
  0x27   : > { %188 = sbr.rel (%p185_p1) target bundleno = 577 (0x241), region = 32  ;;  %s915_s30 = sshll.u32 (!%p185_p1), %s1230_s29, 9 }
  0x28   : > { %s191_s4 = scalar_lea.sflag (!%p185_p1), [#allocation4], %s1230_s29  ;;  %s1234_s5 = scalar_lea.vmem (!%p185_p1), [#allocation3], %s915_s30 }
  0x2c   : > { %1088 = dma.done.wait (%p1195_p8), %s191_s4, 8192  }
  0x2d   : > { %1090 = vsyncadd (%p1195_p8), %s191_s4, 4294959104  ;;  %v300_v0 = vld [vmem:[%s1234_s5 + $0xf8] sm:$0xff]  ;;  %v299_v1 = vld [vmem:[%s1234_s5 + $0xf0] sm:$0xff]  ;;  %vm452_vm0 = vcmask 64512   ;;  %s916_s9 = sshll.u32 %s1230_s29, 8  ;;  %s939_s11 = sshll.u32 %s1109_s15, 8 }
  0x2e   : > { %v298_v2 = vld [vmem:[%s1234_s5 + $0xe8] sm:$0xff]  ;;  %333 = vmatprep.subr.mxu0 %v300_v0  ;;  %v297_v3 = vld [vmem:[%s1234_s5 + $0xe0] sm:$0xff]  ;;  %v296_v4 = vld [vmem:[%s1234_s5 + $0xd8] sm:$0xff]  ;;  %s1375_s10 = scalar_lea.vmem [#allocation6], %s916_s9  ;;  %s1412_s22 = scalar_lea.hbm %s1467_s3, %s939_s11 }
  0x2f   : > { %334 = vmatpush1.msra.mxu0 %v299_v1  ;;  %v295_v5 = vld [vmem:[%s1234_s5 + $0xd0] sm:$0xff]  ;;  %v294_v6 = vld [vmem:[%s1234_s5 + $0xc8] sm:$0xff]  ;;  %v293_v7 = vld [vmem:[%s1234_s5 + $0xc0] sm:$0xff]  ;;  %s807_s18 = sshll.u32 %s1375_s10, 4  ;;  %s794_s23 = scalar_lea.sflag [#allocation5], %s1230_s29  ;;  %s1414_s18 = int_to_ptr.vmem [resolvable:$true] %s807_s18 }
  0x30   : > { %335 = vmatprep.subr.mxu0 %v298_v2  ;;  %v292_v8 = vld [vmem:[%s1234_s5 + $0xb8] sm:$0xff]  ;;  %v291_v9 = vld [vmem:[%s1234_s5 + $0xb0] sm:$0xff]  ;;  %v290_v10 = vld [vmem:[%s1234_s5 + $0xa8] sm:$0xff]  ;;  %v1123_v2 = vmov 0.0   ;;  %s1037_s15 = scalar_lea.vmem %s1414_s18, 4096  ;;  %s1124_s28 = smov [#allocation6]  }
  0x31   : > { %336 = vmatpush1.msra.mxu0 %v297_v3  ;;  %v289_v11 = vld [vmem:[%s1234_s5 + $0xa0] sm:$0xff]  ;;  %v288_v12 = vld [vmem:[%s1234_s5 + $0x98] sm:$0xff]  ;;  %v287_v13 = vld [vmem:[%s1234_s5 + $0x90] sm:$0xff]  ;;  %565 = vmatprep.mubr.f32.mxu1 %v1123_v2  ;;  %p1038_p8 = scmp.ne.s32.totalorder %s1414_s18, %s1037_s15  ;;  %s1041_s30 = sshll.u32 %s1124_s28, 4  ;;  %s1042_s30 = int_to_ptr.vmem [resolvable:$false] %s1041_s30 }
  0x32   : > { %337 = vmatprep.subr.mxu0 %v296_v4  ;;  %v286_v14 = vld [vmem:[%s1234_s5 + $0x88] sm:$0xff]  ;;  %v285_v15 = vld [vmem:[%s1234_s5 + $0x80] sm:$0xff]  ;;  %v284_v16 = vld [vmem:[%s1234_s5 + $0x78] sm:$0xff]  ;;  %s1043_s4 = scalar_lea.vmem %s1042_s30, 8192  ;;  %p1044_p2 = scmp.lt.s32.totalorder %s1414_s18, %s1042_s30 }
  0x33   : > { %338 = vmatpush1.msra.mxu0 %v295_v5  ;;  %v283_v17 = vld [vmem:[%s1234_s5 + $0x70] sm:$0xff]  ;;  %v282_v18 = vld [vmem:[%s1234_s5 + $0x68] sm:$0xff]  ;;  %v281_v19 = vld [vmem:[%s1234_s5 + $0x60] sm:$0xff]  ;;  %p1039_p12 = pnand %p1038_p8, %p1199_p9  ;;  %p1045_p3 = scmp.lt.s32.totalorder %s1043_s4, %s1037_s15 }
  0x34   : > { %339 = vmatprep.subr.mxu0 %v294_v6  ;;  %v280_v20 = vld [vmem:[%s1234_s5 + $0x58] sm:$0xff]  ;;  %v279_v21 = vld [vmem:[%s1234_s5 + $0x50] sm:$0xff]  ;;  %v278_v22 = vld [vmem:[%s1234_s5 + $0x48] sm:$0xff] }
  0x35   : > { %340 = vmatpush1.msra.mxu0 %v293_v7  ;;  %v277_v23 = vld [vmem:[%s1234_s5 + $0x40] sm:$0xff]  ;;  %v268_v24 = vld [vmem:[%s1465_s1 + $0x8] sm:$0xff]  ;;  %v276_v25 = vld [vmem:[%s1234_s5 + $0x38] sm:$0xff]  ;;  %p1040_p0 = pneg %p1039_p12  ;;  %p1046_p5 = por %p1045_p3, %p1044_p2 }
  0x36   : > { %341 = vmatprep.subr.mxu0 %v292_v8  ;;  %397 = vmatprep.mubr.f32.mxu0 %v268_v24  ;;  %v275_v26 = vld [vmem:[%s1234_s5 + $0x30] sm:$0xff]  ;;  %v274_v27 = vld [vmem:[%s1234_s5 + $0x28] sm:$0xff]  ;;  %v273_v28 = vld [vmem:[%s1234_s5 + $0x20] sm:$0xff] }
  0x37   : > { %342 = vmatpush1.msra.mxu0 %v291_v9  ;;  %v272_v29 = vld [vmem:[%s1234_s5 + $0x18] sm:$0xff]  ;;  %v271_v30 = vld [vmem:[%s1234_s5 + $0x10] sm:$0xff]  ;;  %v270_v31 = vld [vmem:[%s1234_s5 + $0x8] sm:$0xff]  ;;  %p1047_p6 = pnand %p1046_p5, %p1040_p0 }
  0x38   : > { %343 = vmatprep.subr.mxu0 %v290_v10  ;;  %v269_v32 = vld [vmem:[%s1234_s5] sm:$0xff]  ;;  %v332_v33 = vld [vmem:[%s1234_s5 + $0x1f8] sm:$0xff]  ;;  %v331_v34 = vld [vmem:[%s1234_s5 + $0x1f0] sm:$0xff] }
  0x39   : > { %344 = vmatpush1.msra.mxu0 %v289_v11  ;;  %v330_v35 = vld [vmem:[%s1234_s5 + $0x1e8] sm:$0xff]  ;;  %v329_v36 = vld [vmem:[%s1234_s5 + $0x1e0] sm:$0xff]  ;;  %v328_v37 = vld [vmem:[%s1234_s5 + $0x1d8] sm:$0xff] }
  0x3a   : > { %345 = vmatprep.subr.mxu0 %v288_v12  ;;  %v327_v38 = vld [vmem:[%s1234_s5 + $0x1d0] sm:$0xff]  ;;  %v326_v39 = vld [vmem:[%s1234_s5 + $0x1c8] sm:$0xff]  ;;  %v325_v40 = vld [vmem:[%s1234_s5 + $0x1c0] sm:$0xff] }
  0x3b   : > { %346 = vmatpush1.msra.mxu0 %v287_v13  ;;  %v324_v41 = vld [vmem:[%s1234_s5 + $0x1b8] sm:$0xff]  ;;  %v323_v42 = vld [vmem:[%s1234_s5 + $0x1b0] sm:$0xff]  ;;  %v322_v43 = vld [vmem:[%s1234_s5 + $0x1a8] sm:$0xff] }
  0x3c   : > { %347 = vmatprep.subr.mxu0 %v286_v14  ;;  %v321_v44 = vld [vmem:[%s1234_s5 + $0x1a0] sm:$0xff]  ;;  %v320_v45 = vld [vmem:[%s1234_s5 + $0x198] sm:$0xff]  ;;  %v319_v46 = vld [vmem:[%s1234_s5 + $0x190] sm:$0xff] }
  0x3d   : > { %348 = vmatpush1.msra.mxu0 %v285_v15  ;;  %v318_v47 = vld [vmem:[%s1234_s5 + $0x188] sm:$0xff]  ;;  %v317_v48 = vld [vmem:[%s1234_s5 + $0x180] sm:$0xff]  ;;  %v316_v49 = vld [vmem:[%s1234_s5 + $0x178] sm:$0xff] }
  0x3e   : > { %349 = vmatprep.subr.mxu0 %v284_v16  ;;  %v315_v50 = vld [vmem:[%s1234_s5 + $0x170] sm:$0xff]  ;;  %v314_v51 = vld [vmem:[%s1234_s5 + $0x168] sm:$0xff]  ;;  %v313_v52 = vld [vmem:[%s1234_s5 + $0x160] sm:$0xff] }
  0x3f   : > { %350 = vmatpush1.msra.mxu0 %v283_v17  ;;  %v312_v53 = vld [vmem:[%s1234_s5 + $0x158] sm:$0xff]  ;;  %v311_v54 = vld [vmem:[%s1234_s5 + $0x150] sm:$0xff]  ;;  %v310_v55 = vld [vmem:[%s1234_s5 + $0x148] sm:$0xff] }
  0x40   : > { %351 = vmatprep.subr.mxu0 %v282_v18  ;;  %v309_v56 = vld [vmem:[%s1234_s5 + $0x140] sm:$0xff]  ;;  %v308_v57 = vld [vmem:[%s1234_s5 + $0x138] sm:$0xff]  ;;  %v307_v58 = vld [vmem:[%s1234_s5 + $0x130] sm:$0xff] }
  0x41   : > { %352 = vmatpush1.msra.mxu0 %v281_v19  ;;  %v306_v59 = vld [vmem:[%s1234_s5 + $0x128] sm:$0xff]  ;;  %v305_v60 = vld [vmem:[%s1234_s5 + $0x120] sm:$0xff]  ;;  %v304_v61 = vld [vmem:[%s1234_s5 + $0x118] sm:$0xff] }
  0x42   : > { %353 = vmatprep.subr.mxu0 %v280_v20  ;;  %v303_v62 = vld [vmem:[%s1234_s5 + $0x110] sm:$0xff]  ;;  %v302_v63 = vld [vmem:[%s1234_s5 + $0x108] sm:$0xff]  ;;  %v301_v0 = vld [vmem:[%s1234_s5 + $0x100] sm:$0xff] }
  0x43   : > { %354 = vmatpush1.msra.mxu0 %v279_v21  ;;  %v267_v1 = vld [vmem:[%s1465_s1] sm:$0xff]  ;;  %v437_v6 = vld [vmem:[%s1464_s0 + $0x8] sm:$0xff]  ;;  %v438_v7 = vld [vmem:[%s1464_s0 + $0x10] sm:$0xff] }
  0x44   : > { %355 = vmatprep.subr.mxu0 %v278_v22  ;;  %v436_v5 = vld [vmem:[%s1464_s0] sm:$0xff]  ;;  %v439_v8 = vld [vmem:[%s1464_s0 + $0x18] sm:$0xff]  ;;  %v441_v10 = vld [vmem:[%s1464_s0 + $0x28] sm:$0xff] }
  0x45   : > { %356 = vmatpush1.msra.mxu0 %v277_v23  ;;  %v440_v9 = vld [vmem:[%s1464_s0 + $0x20] sm:$0xff]  ;;  %v442_v11 = vld [vmem:[%s1464_s0 + $0x30] sm:$0xff]  ;;  %v443_v12 = vld [vmem:[%s1464_s0 + $0x38] sm:$0xff] }
  0x46   : > { %357 = vmatprep.subr.mxu0 %v276_v25  ;;  %v444_v13 = vld [vmem:[%s1464_s0 + $0x40] sm:$0xff]  ;;  %v445_v14 = vld [vmem:[%s1464_s0 + $0x48] sm:$0xff]  ;;  %v446_v15 = vld [vmem:[%s1464_s0 + $0x50] sm:$0xff] }
  0x47   : > { %358 = vmatpush1.msra.mxu0 %v275_v26  ;;  %v447_v16 = vld [vmem:[%s1464_s0 + $0x58] sm:$0xff]  ;;  %v448_v17 = vld [vmem:[%s1464_s0 + $0x60] sm:$0xff]  ;;  %v449_v18 = vld [vmem:[%s1464_s0 + $0x68] sm:$0xff] }
  0x48   : > { %359 = vmatprep.subr.mxu0 %v274_v27  ;;  %v450_v19 = vld [vmem:[%s1464_s0 + $0x70] sm:$0xff]  ;;  %v451_v20 = vld [vmem:[%s1464_s0 + $0x78] sm:$0xff] }
  0x49   : > { %360 = vmatpush1.msra.mxu0 %v273_v28 }
  0x4a   : > { %361 = vmatprep.subr.mxu0 %v272_v29 }
  0x4b   : > { %362 = vmatpush1.msra.mxu0 %v271_v30 }
  0x4c   : > { %363 = vmatprep.subr.mxu0 %v270_v31 }
  0x4d   : > { %364 = vmatpush1.msra.mxu0 %v269_v32 }
  0x4e   : > { %365 = vmatprep.subr.mxu0 %v332_v33 }
  0x4f   : > { %366 = vmatpush2.msra.mxu0 %v331_v34 }
  0x50   : > { %367 = vmatprep.subr.mxu0 %v330_v35 }
  0x51   : > { %368 = vmatpush2.msra.mxu0 %v329_v36 }
  0x52   : > { %369 = vmatprep.subr.mxu0 %v328_v37 }
  0x53   : > { %370 = vmatpush2.msra.mxu0 %v327_v38 }
  0x54   : > { %371 = vmatprep.subr.mxu0 %v326_v39 }
  0x55   : > { %372 = vmatpush2.msra.mxu0 %v325_v40 }
  0x56   : > { %373 = vmatprep.subr.mxu0 %v324_v41 }
  0x57   : > { %374 = vmatpush2.msra.mxu0 %v323_v42 }
  0x58   : > { %375 = vmatprep.subr.mxu0 %v322_v43 }
  0x59   : > { %376 = vmatpush2.msra.mxu0 %v321_v44 }
  0x5a   : > { %377 = vmatprep.subr.mxu0 %v320_v45 }
  0x5b   : > { %378 = vmatpush2.msra.mxu0 %v319_v46 }
  0x5c   : > { %379 = vmatprep.subr.mxu0 %v318_v47 }
  0x5d   : > { %380 = vmatpush2.msra.mxu0 %v317_v48 }
  0x5e   : > { %381 = vmatprep.subr.mxu0 %v316_v49 }
  0x5f   : > { %382 = vmatpush2.msra.mxu0 %v315_v50 }
  0x60   : > { %383 = vmatprep.subr.mxu0 %v314_v51 }
  0x61   : > { %384 = vmatpush2.msra.mxu0 %v313_v52 }
  0x62   : > { %385 = vmatprep.subr.mxu0 %v312_v53 }
  0x63   : > { %386 = vmatpush2.msra.mxu0 %v311_v54 }
  0x64   : > { %387 = vmatprep.subr.mxu0 %v310_v55 }
  0x65   : > { %388 = vmatpush2.msra.mxu0 %v309_v56 }
  0x66   : > { %389 = vmatprep.subr.mxu0 %v308_v57 }
  0x67   : > { %390 = vmatpush2.msra.mxu0 %v307_v58 }
  0x68   : > { %391 = vmatprep.subr.mxu0 %v306_v59 }
  0x69   : > { %392 = vmatpush2.msra.mxu0 %v305_v60 }
  0x6a   : > { %393 = vmatprep.subr.mxu0 %v304_v61 }
  0x6b   : > { %394 = vmatpush2.msra.mxu0 %v303_v62 }
  0x6c   : > { %395 = vmatprep.subr.mxu0 %v302_v63 }
  0x6d   : > { %396 = vmatpush2.msra.mxu0 %v301_v0 }
  0x6e   : > { %398 = vmatmul.mubr.f32.vlgmr.msra.gmra.mxu0 %v267_v1 }
 0x12e   : > { %v399_v3 = vpop.f32.mrf.mxu0 }
 0x130   : > { %v401_v4 = vpop.f32.mrf.mxu0 }
 0x131   : > { %531 = vmatprep.subr.mxu1 %v401_v4 }
 0x132   : > { %532 = vmatpush1.msra.mxu1 %v399_v3 }
 0x133   : > { %917 = vmatmul.mubr.msk.f32.vlgmr.msra.gmra.mxu1 %vm452_vm0, %v436_v5 }
 0x134   : > { %571 = vmatprep.mubr.f32.mxu1 %v1123_v2 }
 0x137   : > { %918 = vmatmul.mubr.msk.f32.gmra.mxu1 %vm452_vm0, %v437_v6 }
 0x138   : > { %577 = vmatprep.mubr.f32.mxu1 %v1123_v2 }
 0x13b   : > { %919 = vmatmul.mubr.msk.f32.gmra.mxu1 %vm452_vm0, %v438_v7 }
 0x13c   : > { %583 = vmatprep.mubr.f32.mxu1 %v1123_v2 }
 0x13f   : > { %920 = vmatmul.mubr.msk.f32.gmra.mxu1 %vm452_vm0, %v439_v8 }
 0x140   : > { %589 = vmatprep.mubr.f32.mxu1 %v1123_v2 }
 0x143   : > { %921 = vmatmul.mubr.msk.f32.gmra.mxu1 %vm452_vm0, %v440_v9 }
 0x144   : > { %595 = vmatprep.mubr.f32.mxu1 %v1123_v2 }
 0x147   : > { %922 = vmatmul.mubr.msk.f32.gmra.mxu1 %vm452_vm0, %v441_v10 }
 0x148   : > { %601 = vmatprep.mubr.f32.mxu1 %v1123_v2 }
 0x14b   : > { %923 = vmatmul.mubr.msk.f32.gmra.mxu1 %vm452_vm0, %v442_v11 }
 0x14c   : > { %607 = vmatprep.mubr.f32.mxu1 %v1123_v2 }
 0x14f   : > { %924 = vmatmul.mubr.msk.f32.gmra.mxu1 %vm452_vm0, %v443_v12 }
 0x150   : > { %613 = vmatprep.mubr.f32.mxu1 %v1123_v2 }
 0x153   : > { %925 = vmatmul.mubr.msk.f32.gmra.mxu1 %vm452_vm0, %v444_v13 }
 0x154   : > { %619 = vmatprep.mubr.f32.mxu1 %v1123_v2 }
 0x157   : > { %926 = vmatmul.mubr.msk.f32.gmra.mxu1 %vm452_vm0, %v445_v14 }
 0x158   : > { %625 = vmatprep.mubr.f32.mxu1 %v1123_v2 }
 0x15b   : > { %927 = vmatmul.mubr.msk.f32.gmra.mxu1 %vm452_vm0, %v446_v15 }
 0x15c   : > { %631 = vmatprep.mubr.f32.mxu1 %v1123_v2 }
 0x15f   : > { %928 = vmatmul.mubr.msk.f32.gmra.mxu1 %vm452_vm0, %v447_v16 }
 0x160   : > { %637 = vmatprep.mubr.f32.mxu1 %v1123_v2 }
 0x163   : > { %929 = vmatmul.mubr.msk.f32.gmra.mxu1 %vm452_vm0, %v448_v17 }
 0x164   : > { %643 = vmatprep.mubr.f32.mxu1 %v1123_v2 }
 0x167   : > { %930 = vmatmul.mubr.msk.f32.gmra.mxu1 %vm452_vm0, %v449_v18 }
 0x168   : > { %649 = vmatprep.mubr.f32.mxu1 %v1123_v2 }
 0x16b   : > { %931 = vmatmul.mubr.msk.f32.gmra.mxu1 %vm452_vm0, %v450_v19 }
 0x16c   : > { %655 = vmatprep.mubr.f32.mxu1 %v1123_v2 }
 0x16f   : > { %932 = vmatmul.mubr.msk.f32.gmra.mxu1 %vm452_vm0, %v451_v20 }
 0x1f3   : > { %v567_v21 = vpop.f32.mrf.mxu1 }
 0x1f4   : > { %761 = vst [vmem:[%s1375_s10] sm:$0xff] %v567_v21 }
 0x1f5   : > { %v569_v22 = vpop.f32.mrf.mxu1 }
 0x1f6   : > { %762 = vst [vmem:[%s1375_s10 + $0x8] sm:$0xff] %v569_v22 }
 0x1f7   : > { %v573_v23 = vpop.f32.mrf.mxu1 }
 0x1f8   : > { %763 = vst [vmem:[%s1375_s10 + $0x10] sm:$0xff] %v573_v23 }
 0x1f9   : > { %v575_v24 = vpop.f32.mrf.mxu1 }
 0x1fa   : > { %764 = vst [vmem:[%s1375_s10 + $0x18] sm:$0xff] %v575_v24 }
 0x1fb   : > { %v579_v25 = vpop.f32.mrf.mxu1 }
 0x1fc   : > { %765 = vst [vmem:[%s1375_s10 + $0x20] sm:$0xff] %v579_v25 }
 0x1fd   : > { %v581_v26 = vpop.f32.mrf.mxu1 }
 0x1fe   : > { %766 = vst [vmem:[%s1375_s10 + $0x28] sm:$0xff] %v581_v26 }
 0x1ff   : > { %v585_v27 = vpop.f32.mrf.mxu1 }
 0x200   : > { %767 = vst [vmem:[%s1375_s10 + $0x30] sm:$0xff] %v585_v27 }
 0x201   : > { %v587_v28 = vpop.f32.mrf.mxu1 }
 0x202   : > { %768 = vst [vmem:[%s1375_s10 + $0x38] sm:$0xff] %v587_v28 }
 0x203   : > { %v591_v29 = vpop.f32.mrf.mxu1 }
 0x204   : > { %769 = vst [vmem:[%s1375_s10 + $0x40] sm:$0xff] %v591_v29 }
 0x205   : > { %v593_v30 = vpop.f32.mrf.mxu1 }
 0x206   : > { %770 = vst [vmem:[%s1375_s10 + $0x48] sm:$0xff] %v593_v30 }
 0x207   : > { %v597_v31 = vpop.f32.mrf.mxu1 }
 0x208   : > { %771 = vst [vmem:[%s1375_s10 + $0x50] sm:$0xff] %v597_v31 }
 0x209   : > { %v599_v32 = vpop.f32.mrf.mxu1 }
 0x20a   : > { %772 = vst [vmem:[%s1375_s10 + $0x58] sm:$0xff] %v599_v32 }
 0x20b   : > { %v603_v33 = vpop.f32.mrf.mxu1 }
 0x20c   : > { %773 = vst [vmem:[%s1375_s10 + $0x60] sm:$0xff] %v603_v33 }
 0x20d   : > { %v605_v34 = vpop.f32.mrf.mxu1 }
 0x20e   : > { %774 = vst [vmem:[%s1375_s10 + $0x68] sm:$0xff] %v605_v34 }
 0x20f   : > { %v609_v35 = vpop.f32.mrf.mxu1 }
 0x210   : > { %775 = vst [vmem:[%s1375_s10 + $0x70] sm:$0xff] %v609_v35 }
 0x211   : > { %v611_v36 = vpop.f32.mrf.mxu1 }
 0x212   : > { %776 = vst [vmem:[%s1375_s10 + $0x78] sm:$0xff] %v611_v36 }
 0x213   : > { %v615_v37 = vpop.f32.mrf.mxu1 }
 0x214   : > { %777 = vst [vmem:[%s1375_s10 + $0x80] sm:$0xff] %v615_v37 }
 0x215   : > { %v617_v38 = vpop.f32.mrf.mxu1 }
 0x216   : > { %778 = vst [vmem:[%s1375_s10 + $0x88] sm:$0xff] %v617_v38 }
 0x217   : > { %v621_v39 = vpop.f32.mrf.mxu1 }
 0x218   : > { %779 = vst [vmem:[%s1375_s10 + $0x90] sm:$0xff] %v621_v39 }
 0x219   : > { %v623_v40 = vpop.f32.mrf.mxu1 }
 0x21a   : > { %780 = vst [vmem:[%s1375_s10 + $0x98] sm:$0xff] %v623_v40 }
 0x21b   : > { %v627_v41 = vpop.f32.mrf.mxu1 }
 0x21c   : > { %781 = vst [vmem:[%s1375_s10 + $0xa0] sm:$0xff] %v627_v41 }
 0x21d   : > { %v629_v42 = vpop.f32.mrf.mxu1 }
 0x21e   : > { %782 = vst [vmem:[%s1375_s10 + $0xa8] sm:$0xff] %v629_v42 }
 0x21f   : > { %v633_v43 = vpop.f32.mrf.mxu1 }
 0x220   : > { %783 = vst [vmem:[%s1375_s10 + $0xb0] sm:$0xff] %v633_v43 }
 0x221   : > { %v635_v44 = vpop.f32.mrf.mxu1 }
 0x222   : > { %784 = vst [vmem:[%s1375_s10 + $0xb8] sm:$0xff] %v635_v44 }
 0x223   : > { %v639_v45 = vpop.f32.mrf.mxu1 }
 0x224   : > { %785 = vst [vmem:[%s1375_s10 + $0xc0] sm:$0xff] %v639_v45 }
 0x225   : > { %v641_v46 = vpop.f32.mrf.mxu1 }
 0x226   : > { %786 = vst [vmem:[%s1375_s10 + $0xc8] sm:$0xff] %v641_v46 }
 0x227   : > { %v645_v47 = vpop.f32.mrf.mxu1 }
 0x228   : > { %787 = vst [vmem:[%s1375_s10 + $0xd0] sm:$0xff] %v645_v47 }
 0x229   : > { %v647_v48 = vpop.f32.mrf.mxu1 }
 0x22a   : > { %788 = vst [vmem:[%s1375_s10 + $0xd8] sm:$0xff] %v647_v48 }
 0x22b   : > { %v651_v49 = vpop.f32.mrf.mxu1 }
 0x22c   : > { %789 = vst [vmem:[%s1375_s10 + $0xe0] sm:$0xff] %v651_v49 }
 0x22d   : > { %v653_v50 = vpop.f32.mrf.mxu1 }
 0x22e   : > { %790 = vst [vmem:[%s1375_s10 + $0xe8] sm:$0xff] %v653_v50 }
 0x22f   : > { %v657_v51 = vpop.f32.mrf.mxu1 }
 0x230   : > { %791 = vst [vmem:[%s1375_s10 + $0xf0] sm:$0xff] %v657_v51 }
 0x231   : > { %v659_v52 = vpop.f32.mrf.mxu1 }
 0x232   : > { %792 = vst [vmem:[%s1375_s10 + $0xf8] sm:$0xff] %v659_v52 }
 0x233   : > { %1050 = shalt.err (!%p1047_p6)
}
 0x234   : > { %s1051_s5 = scalar_lea.hbm %s1412_s22, 4096  ;;  %s1055_s7 = scalar_lea.hbm %s1467_s3, 8192 }
 0x235   : > { %p1052_p7 = scmp.ne.s32.totalorder %s1412_s22, %s1051_s5  ;;  %p1056_p13 = scmp.lt.s32.totalorder %s1412_s22, %s1467_s3 }
 0x236   : > { %p1057_p1 = scmp.lt.s32.totalorder %s1055_s7, %s1051_s5 }
 0x237   : > { %p1053_p10 = pnand %p1052_p7, %p1199_p9 }
 0x238   : > { %p1058_p8 = por %p1057_p1, %p1056_p13 }
 0x239   : > { %p1054_p4 = pneg %p1053_p10 }
 0x23b   : > { %p1059_p12 = pnand %p1058_p8, %p1054_p4 }
 0x23d   : > { %1062 = shalt.err (!%p1059_p12)
}
 0x23e   : > { %s1125_s10 = smov 256   ;;  %s1126_s11 = smov 512  }
 0x23f   : > { %s1127_s19 = smov 16  }
 0x240   : > { %942 = dma.vmem_to_hbm [thread:$0]  (%p1199_p9), %s1414_s18, 4096, %s1412_s22, %s794_s23, %s1125_s10, %s1126_s11, %s1127_s19  }
 0x241 PF: > { %s822_s21 = sand.u32 1, %s1097_s12   ;;  %p1473_p0 = scmp.ge.s32.totalorder %s1117_s17, 2 }
 0x242   : > { %s823_s15 = scalar_lea.sflag [#allocation5], %s822_s21 }
 0x243   : > { %p949_p2 = pnand %p1473_p0, %p1206_p11 }
 0x245   : > { %p950_p3 = pneg %p949_p2 }
 0x247   : > { %1092 = dma.done.wait (%p950_p3), %s823_s15, 4096  }
 0x248   : > { %1094 = vsyncadd (%p950_p3), %s823_s15, 4294963200  ;;  %s19_s17 = sadd.s32 1, %s1117_s17   ;;  %s1474_s12 = smov %s1101_s13 }
 0x249   : > { %p16_p5 = scmp.ge.s32.totalorder %s19_s17, 4   ;;  %s1475_s13 = smov %s1105_s14 }
 0x24a   : > { %s1476_s14 = smov %s1204_s26  ;;  %s1477_s15 = smov %s1113_s16 }
 0x24b   : > { %s1478_s16 = smov %s1480_s20  ;;  %18 = sbr.rel (!%p16_p5) target bundleno = 6 (0x6), region = 88 }
 0x250   :  { %828 = vsyncpa [#allocation4], 1 }
 0x251   :  { %830 = vsyncpa [#allocation4 + $0x1], 1 }
 0x252   :  { %831 = vsyncpa [#allocation5], 1 }
 0x253   :  { %833 = vsyncpa [#allocation5 + $0x1], 1 }

</bundles_post_ra>
